<compile_context>
chip_gen: v7x
topology: tpu7x:2x2x1
jax: 0.10.0
libtpu: 0.0.40
codegen_flags: <defaults>
</compile_context>

<pallas_src>
import functools

import jax
import jax.numpy as jnp
import numpy as np
from jax.experimental import pallas as pl
from jax.experimental.pallas import tpu as pltpu


# ================================ BlurUpsample ================================

def _upsample_matrix_np(h: int) -> np.ndarray:
    """(2h, h): bilinear x2 upsample, align_corners=False (PyTorch semantics)."""
    out = 2 * h
    o = np.arange(out, dtype=np.float64)
    src = (o + 0.5) / 2.0 - 0.5
    i0 = np.floor(src)
    frac = (src - i0).astype(np.float32)
    i0c = np.clip(i0, 0, h - 1).astype(np.int64)
    i1c = np.clip(i0 + 1.0, 0, h - 1).astype(np.int64)
    rows = np.arange(out)
    m = np.zeros((out, h), np.float32)
    m[rows, i0c] += 1.0 - frac
    m[rows, i1c] += frac
    return m


def _blur_matrix_np(n: int) -> np.ndarray:
    """(n, n): 1D [1,2,1]/4 blur with reflect padding."""
    b = np.zeros((n, n), np.float32)
    idx = np.arange(n)
    for wk, off in ((0.25, -1), (0.5, 0), (0.25, 1)):
        j = idx + off
        j = np.where(j < 0, -j, j)
        j = np.where(j >= n, 2 * (n - 1) - j, j)
        b[idx, j] += wk
    return b


@functools.lru_cache(maxsize=None)
def _blur_upsample_operator(h: int, w: int) -> jnp.ndarray:
    """Cached fused operator K^T: (H*W, 2H*2W).  Coefficients are exact in bf16."""
    a_h = _blur_matrix_np(2 * h) @ _upsample_matrix_np(h)   # (2H, H)
    a_w = _blur_matrix_np(2 * w) @ _upsample_matrix_np(w)   # (2W, W)
    k = np.einsum("ah,bw->abhw", a_h, a_w).reshape(4 * h * w, h * w)
    return jnp.asarray(k.T, dtype=jnp.bfloat16)             # (H*W, 2H*2W)


def _blur_upsample_kernel(kmat_ref, x_ref, o_ref):
    # kmat_ref: (H*W, 2H*2W) bf16 (resident); x_ref: (P, H*W) bf16
    # o_ref   : (P, 2H*2W) f32  -- lane-dense (>= 128-wide) stores.
    o_ref[...] = jnp.dot(
        x_ref[...], kmat_ref[...], preferred_element_type=jnp.float32
    ).astype(o_ref.dtype)


def blur_upsample(x: jnp.ndarray) -> jnp.ndarray:
    """BlurUpsample forward. x: (N, C, H, W) -> (N, C, 2H, 2W) float32."""
    n, c, h, w = x.shape
    hw, ohw = h * w, 4 * h * w
    kmat = _blur_upsample_operator(h, w)

    planes = n * c
    # Planes-per-block: as many as an ~8 MiB double-buffered budget allows,
    # but keep >= 2 grid steps when there is enough work (v7x: 2 TensorCores).
    per_plane = 2 * hw * 2 + 2 * ohw * 4          # bf16 in + f32 out, x2 buffers
    p = max(8, min(int((8 * 1024 * 1024) // per_plane), planes))
    if planes > 8 and 2 * p > planes:
        p = pl.cdiv(planes, 2)
    p = ((p + 7) // 8) * 8                        # sublane multiple
    padded = pl.cdiv(planes, p) * p

    xf = x.reshape(planes, hw).astype(jnp.bfloat16)
    if padded != planes:
        xf = jnp.pad(xf, ((0, padded - planes), (0, 0)))

    out = pl.pallas_call(
        _blur_upsample_kernel,
        out_shape=jax.ShapeDtypeStruct((padded, ohw), jnp.float32),
        grid_spec=pltpu.PrefetchScalarGridSpec(
            num_scalar_prefetch=0,
            grid=(padded // p,),
            in_specs=[
                pl.BlockSpec((hw, ohw), lambda i: (0, 0)),   # operator (shared)
                pl.BlockSpec((p, hw), lambda i: (i, 0)),     # plane chunk i
            ],
            out_specs=pl.BlockSpec((p, ohw), lambda i: (i, 0)),
        ),
        compiler_params=pltpu.CompilerParams(
            dimension_semantics=("parallel",),
            vmem_limit_bytes=32 * 1024 * 1024,
        ),
    )(kmat, xf)

    return out[:planes].reshape(n, c, 2 * h, 2 * w)


# ========================= StyleBlock (fused mod-conv) ========================

def _style_conv_kernel_factory(has_noise: bool, has_residual: bool, slope: float):
    def kernel(*refs):
        i = 0
        x_ref = refs[i]; i += 1        # (1, K, HW)   im2col'd activations
        w_ref = refs[i]; i += 1        # (1, O, K)    per-sample mod/demod weights
        b_ref = refs[i]; i += 1        # (O, 1)       conv bias
        n_ref = None
        r_ref = None
        if has_noise:
            n_ref = refs[i]; i += 1    # (1, 1, HW)   pre-scaled noise
        if has_residual:
            r_ref = refs[i]; i += 1    # (1, O, HW)   upsampled rgb residual
        o_ref = refs[i]                # (1, O, HW)

        acc = jnp.dot(w_ref[0], x_ref[0], preferred_element_type=jnp.float32)
        if has_noise:
            acc = acc + n_ref[0]
        acc = acc + b_ref[...]
        acc = jnp.where(acc >= 0, acc, slope * acc)      # LeakyReLU(0.2)
        if has_residual:
            acc = acc + r_ref[0]
        o_ref[0] = acc.astype(o_ref.dtype)

    return kernel


def _modulated_conv_act(xcol, wmat, bias, noise, residual):
    """Fused per-sample modulated conv + noise + bias + LeakyReLU [+ residual]."""
    n, k, hw = xcol.shape
    o = wmat.shape[1]
    has_noise = noise is not None
    has_res = residual is not None

    in_specs = [
        pl.BlockSpec((1, k, hw), lambda i: (i, 0, 0)),
        pl.BlockSpec((1, o, k), lambda i: (i, 0, 0)),
        pl.BlockSpec((o, 1), lambda i: (0, 0)),
    ]
    inputs = [xcol, wmat, bias]
    if has_noise:
        in_specs.append(pl.BlockSpec((1, 1, hw), lambda i: (i, 0, 0)))
        inputs.append(noise)
    if has_res:
        in_specs.append(pl.BlockSpec((1, o, hw), lambda i: (i, 0, 0)))
        inputs.append(residual)

    return pl.pallas_call(
        _style_conv_kernel_factory(has_noise, has_res, 0.2),
        out_shape=jax.ShapeDtypeStruct((n, o, hw), jnp.float32),
        grid_spec=pltpu.PrefetchScalarGridSpec(
            num_scalar_prefetch=0,
            grid=(n,),
            in_specs=in_specs,
            out_specs=pl.BlockSpec((1, o, hw), lambda i: (i, 0, 0)),
        ),
        compiler_params=pltpu.CompilerParams(
            dimension_semantics=("parallel",),
        ),
    )(*inputs)


def style_block_apply(p, x, w_latent, stochastic_noise, *, ksize, demod,
                      add_noise, residual=None, eps=1e-8):
    """StyleBlock.forward (modulated conv + optional noise + bias + LeakyReLU)."""
    n, c, h, w = x.shape
    o = p["weight"].shape[0]
    w_dim = p["a_weight"].shape[1]

    # EqualLinear style scores (glue; tiny).
    s = w_latent @ (p["a_weight"].T / np.sqrt(w_dim)) + p["a_bias"]      # (N, C)

    # Per-sample modulated (and demodulated) weights (glue; tiny).
    w1 = p["weight"][None] * s[:, None, :, None, None]                   # (N,O,C,k,k)
    if demod:
        d = jax.lax.rsqrt(jnp.sum(w1 * w1, axis=(2, 3, 4)) + eps)        # (N, O)
        w1 = w1 * d[:, :, None, None, None]
    wmat = jnp.transpose(w1, (0, 1, 3, 4, 2)).reshape(n, o, ksize * ksize * c)

    # im2col, tap-major to match wmat layout (glue).
    pad = ksize // 2
    if pad:
        xp = jnp.pad(x, ((0, 0), (0, 0), (pad, pad), (pad, pad)))
        cols = [xp[:, :, dy:dy + h, dx:dx + w]
                for dy in range(ksize) for dx in range(ksize)]
        xcol = jnp.stack(cols, axis=1).reshape(n, ksize * ksize * c, h * w)
    else:
        xcol = x.reshape(n, c, h * w)

    noise = None
    if add_noise:
        noise = (stochastic_noise[:, :1, :h, :w] * p["scale_noise"])
        noise = noise.reshape(n, 1, h * w).astype(jnp.float32)

    res = residual.reshape(n, o, h * w).astype(jnp.float32) if residual is not None else None
    bias = p["bias"].reshape(o, 1)

    out = _modulated_conv_act(xcol.astype(jnp.float32),
                              wmat.astype(jnp.float32), bias, noise, res)
    return out.reshape(n, o, h, w)


# ============================== GeneratorBlock ================================

def generator_block_apply(params, x, w, stochastic_noise, rgb):
    """GeneratorBlock.forward (upsample=True, add_noise=True)."""
    x = blur_upsample(x)
    rgb_up = blur_upsample(rgb)
    x = style_block_apply(params["style1"], x, w, stochastic_noise,
                          ksize=3, demod=True, add_noise=True)
    x = style_block_apply(params["style2"], x, w, stochastic_noise,
                          ksize=3, demod=True, add_noise=True)
    # to_rgb: 1x1, no demod, no noise; the rgb residual add is fused in-kernel.
    rgb = style_block_apply(params["to_rgb"], x, w, None,
                            ksize=1, demod=False, add_noise=False,
                            residual=rgb_up)
    return x, rgb


# ========================= Pure-JAX reference (f32) ===========================

def _ref_blur_upsample(x):
    n, c, h, w = x.shape
    a_h = jnp.asarray(_blur_matrix_np(2 * h) @ _upsample_matrix_np(h))
    a_w = jnp.asarray(_blur_matrix_np(2 * w) @ _upsample_matrix_np(w))
    return jnp.einsum("oh,nchw,pw->ncop", a_h, x, a_w)


def _ref_style_block(p, x, w_latent, stochastic_noise, *, ksize, demod,
                     add_noise, eps=1e-8):
    n, c, h, w = x.shape
    w_dim = p["a_weight"].shape[1]
    s = w_latent @ (p["a_weight"].T / np.sqrt(w_dim)) + p["a_bias"]
    w1 = p["weight"][None] * s[:, None, :, None, None]
    if demod:
        d = jax.lax.rsqrt(jnp.sum(w1 * w1, axis=(2, 3, 4)) + eps)
        w1 = w1 * d[:, :, None, None, None]
    pad = ksize // 2
    xp = jnp.pad(x, ((0, 0), (0, 0), (pad, pad), (pad, pad))) if pad else x
    out = jnp.zeros((n, w1.shape[1], h, w), jnp.float32)
    for dy in range(ksize):
        for dx in range(ksize):
            out = out + jnp.einsum("noc,nchw->nohw", w1[:, :, :, dy, dx],
                                   xp[:, :, dy:dy + h, dx:dx + w])
    if add_noise:
        out = out + stochastic_noise[:, :1, :h, :w] * p["scale_noise"]
    out = out + p["bias"][None, :, None, None]
    return jnp.where(out >= 0, out, 0.2 * out)


def _ref_generator_block(params, x, w, stochastic_noise, rgb):
    x = _ref_blur_upsample(x)
    rgb_up = _ref_blur_upsample(rgb)
    x = _ref_style_block(params["style1"], x, w, stochastic_noise,
                         ksize=3, demod=True, add_noise=True)
    x = _ref_style_block(params["style2"], x, w, stochastic_noise,
                         ksize=3, demod=True, add_noise=True)
    x_rgb = _ref_style_block(params["to_rgb"], x, w, None,
                             ksize=1, demod=False, add_noise=False)
    return x, rgb_up + x_rgb


# ==================================== main ====================================

if __name__ == "__main__":
    key = jax.random.PRNGKey(0)
    N, CIN, COUT, H, W, WDIM = 2, 4, 8, 16, 16, 32
    keys = jax.random.split(key, 16)

    def style_params(k0, k1, k2, k3, ci, co, ksize, add_noise):
        p = {
            "weight": jax.random.normal(k0, (co, ci, ksize, ksize), jnp.float32)
            / np.sqrt(ci * ksize * ksize),
            "bias": 0.1 * jax.random.normal(k1, (co,), jnp.float32),
            "a_weight": jax.random.normal(k2, (ci, WDIM), jnp.float32),
            "a_bias": jnp.ones((ci,), jnp.float32),   # EqualLinear bias init = 1
        }
        if add_noise:
            p["scale_noise"] = 0.1 * jax.random.normal(k3, (), jnp.float32)
        return p

    params = {
        "style1": style_params(keys[0], keys[1], keys[2], keys[3], CIN, CIN, 3, True),
        "style2": style_params(keys[4], keys[5], keys[6], keys[7], CIN, COUT, 3, True),
        "to_rgb": style_params(keys[8], keys[9], keys[10], keys[11], COUT, 3, 1, False),
    }

    x = jax.random.normal(keys[12], (N, CIN, H, W), jnp.float32)
    w = jax.random.normal(keys[13], (N, WDIM), jnp.float32)
    stochastic_noise = jax.random.normal(keys[14], (N, 1, 2 * H, 2 * W), jnp.float32)
    rgb = jax.random.normal(keys[15], (N, 3, H, W), jnp.float32)

    x_out, rgb_out = generator_block_apply(params, x, w, stochastic_noise, rgb)
    x_out = jax.block_until_ready(x_out)
    rgb_out = jax.block_until_ready(rgb_out)
    assert x_out.shape == (N, COUT, 2 * H, 2 * W), x_out.shape
    assert rgb_out.shape == (N, 3, 2 * H, 2 * W), rgb_out.shape

    # Sanity checks vs a pure-JAX f32 reference (kernel path uses bf16 inputs
    # in the upsample matmul, hence the loose tolerances).
    up_ref = _ref_blur_upsample(x)
    assert jnp.max(jnp.abs(blur_upsample(x) - up_ref)) < 3e-2

    x_ref, rgb_ref = _ref_generator_block(params, x, w, stochastic_noise, rgb)
    assert jnp.max(jnp.abs(x_out - x_ref)) < 1e-1
    assert jnp.max(jnp.abs(rgb_out - rgb_ref)) < 1e-1

    print("KERNEL_OK")
</pallas_src>

<mosaic_0001>
module attributes {stable_mosaic.version = 11 : i64} {
  func.func @_blur_upsample_kernel(%arg0: i32, %arg1: memref<256x1024xbf16, #tpu.memory_space<vmem>>, %arg2: memref<8x256xbf16, #tpu.memory_space<vmem>>, %arg3: memref<8x1024xf32, #tpu.memory_space<vmem>>) attributes {dimension_semantics = [#tpu.dimension_semantics<parallel>], iteration_bounds = array<i64: 1>, scalar_prefetch = 0 : i64, scratch_operands = 0 : i64, tpu.core_type = #tpu.core_type<tc>, window_params = [{pipeline_mode = #tpu.pipeline_mode<synchronous>, transform_indices = @transform_0, window_bounds = array<i64: 256, 1024>}, {transform_indices = @transform_1, window_bounds = array<i64: 8, 256>}, {transform_indices = @transform_2, window_bounds = array<i64: 8, 1024>}]} {
    %c0 = arith.constant 0 : index
    %c0_0 = arith.constant 0 : index
    %0 = vector.load %arg2[%c0, %c0_0] : memref<8x256xbf16, #tpu.memory_space<vmem>>, vector<8x256xbf16>
    %c0_1 = arith.constant 0 : index
    %c0_2 = arith.constant 0 : index
    %1 = vector.load %arg1[%c0_1, %c0_2] : memref<256x1024xbf16, #tpu.memory_space<vmem>>, vector<256x1024xbf16>
    %cst = arith.constant dense<0.000000e+00> : vector<8x1024xf32>
    %2 = tpu.matmul %0, %1, %cst {dimension_numbers = #tpu.dot_dimension_numbers<[1], [0], [0], [1], [0, 0, 1, 1], [], []>} : vector<8x256xbf16>, vector<256x1024xbf16>, vector<8x1024xf32> -> vector<8x1024xf32>
    %c0_3 = arith.constant 0 : index
    %c0_4 = arith.constant 0 : index
    %3 = vector.load %arg3[%c0_3, %c0_4] : memref<8x1024xf32, #tpu.memory_space<vmem>>, vector<8x1024xf32>
    tpu.vector_store %arg3[%c0_3, %c0_4], %2 {strides = array<i32>} : memref<8x1024xf32, #tpu.memory_space<vmem>>, vector<8x1024xf32>,
    return
  }
  func.func @transform_0(%arg0: i32) -> (i32, i32) {
    %c0_i32 = arith.constant 0 : i32
    %c0_i32_0 = arith.constant 0 : i32
    %c0_i32_1 = arith.constant 0 : i32
    return %c0_i32, %c0_i32_0 : i32, i32
  }
  func.func @transform_1(%arg0: i32) -> (i32, i32) {
    %c0_i32 = arith.constant 0 : i32
    %c0_i32_0 = arith.constant 0 : i32
    return %arg0, %c0_i32 : i32, i32
  }
  func.func @transform_2(%arg0: i32) -> (i32, i32) {
    %c0_i32 = arith.constant 0 : i32
    %c0_i32_0 = arith.constant 0 : i32
    return %arg0, %c0_i32 : i32, i32
  }
}

</mosaic_0001>

<bundles_post_ra>
// kernel: tpu_custom_call.1
= control target key start
LH: loop header
LB: loop body
LE: loop exit
PB: predicated region body
PF: predicated region fallthrough
CT: control target
= control target key end

     0   :  { %7 = vsyncpa [#allocation3], 0  ;;  %s1285_s0 = inlined_call_operand.hbm [shape: bf16[256,1024], index: 0, kind: input, shape index: {}]   ;;  %s1286_s1 = inlined_call_operand.hbm [shape: bf16[8,256], index: 1, kind: input, shape index: {}]   ;;  %s1287_s2 = inlined_call_operand.hbm [shape: f32[8,1024], index: 2, kind: output, shape index: {}]  }
   0x1   :  { %8 = vsyncpa [#allocation6], 0 }
   0x2   :  { %9 = vsyncpa [#allocation4], 0  ;;  %s1211_s9 = smov [#allocation2]   ;;  %s1139_s13 = scalar_lea.hbm %s1285_s0, 16384 }
   0x3   :  { %s15_s10 = sshll.u32 %s1211_s9, 4  ;;  %p1140_p0 = scmp.ne.s32.totalorder %s1285_s0, %s1139_s13  ;;  %s16_s10 = int_to_ptr.vmem [resolvable:$true] %s15_s10 }
   0x4   :  { %p1143_p1 = scmp.lt.u32.totalorder %s1139_s13, %s1285_s0 }
   0x6   :  { %p1145_p2 = pnand %p1143_p1, %p1140_p0 }
   0x8   :  { %1148 = shalt.err (!%p1145_p2)
}
   0x9   :  { %s1149_s18 = scalar_lea.vmem %s16_s10, 16384  ;;  %p1154_p4 = scmp.lt.s32.totalorder %s16_s10, %s16_s10 }
   0xa   :  { %p1150_p3 = scmp.ne.s32.totalorder %s16_s10, %s1149_s18  ;;  %p1155_p5 = scmp.lt.s32.totalorder %s1149_s18, %s1149_s18 }
   0xc   :  { %p1156_p6 = por %p1155_p5, %p1154_p4 }
   0xe   :  { %p1157_p7 = pnand %p1156_p6, %p1150_p3 }
  0x10   :  { %1160 = shalt.err (!%p1157_p7)
}
  0x11   :  { %s1212_s19 = smov 512   ;;  %s1213_s20 = smov 32  }
  0x12   :  { %21 = dma.hbm_to_vmem [thread:$0]  %s1285_s0, 16384, %s16_s10, [#allocation3], %s1212_s19, %s1212_s19, %s1213_s20  }
  0x13   :  { %s1214_s23 = smov [#allocation5]   ;;  %s1161_s27 = scalar_lea.hbm %s1286_s1, 128 }
  0x14   :  { %s28_s24 = sshll.u32 %s1214_s23, 4  ;;  %p1162_p8 = scmp.ne.s32.totalorder %s1286_s1, %s1161_s27  ;;  %s29_s24 = int_to_ptr.vmem [resolvable:$true] %s28_s24 }
  0x15   :  { %p1165_p9 = scmp.lt.u32.totalorder %s1161_s27, %s1286_s1 }
  0x17   :  { %p1167_p10 = pnand %p1165_p9, %p1162_p8 }
  0x19   :  { %1170 = shalt.err (!%p1167_p10)
}
  0x1a   :  { %s1171_s4 = scalar_lea.vmem %s29_s24, 128  ;;  %p1176_p12 = scmp.lt.s32.totalorder %s29_s24, %s29_s24 }
  0x1b   :  { %p1172_p11 = scmp.ne.s32.totalorder %s29_s24, %s1171_s4  ;;  %p1177_p13 = scmp.lt.s32.totalorder %s1171_s4, %s1171_s4 }
  0x1d   :  { %p1178_p0 = por %p1177_p13, %p1176_p12 }
  0x1f   :  { %p1179_p1 = pnand %p1178_p0, %p1172_p11 }
  0x21   :  { %1182 = shalt.err (!%p1179_p1)
}
  0x22   :  { %31 = dma.hbm_to_vmem [thread:$0]  %s1286_s1, 128, %s29_s24, [#allocation6]  }
  0x23   :  { %1205 = dma.done.wait [#allocation3], 16384  }
  0x24   :  { %1206 = vsyncadd [#allocation3], 4294950912 }
  0x25   :  { %1207 = dma.done.wait [#allocation6], 128  }
  0x26   :  { %1208 = vsyncadd [#allocation6], 4294967168  ;;  %v39_v0 = vld [vmem:[#allocation2] sm:$0xff]  ;;  %v40_v2 = vld [vmem:[#allocation2 + $0x8] sm:$0xff]  ;;  %s1215_s1 = smov [#allocation7]  }
  0x27   :  { %v43_v1 = vld [vmem:[#allocation2 + $0x20] sm:$0xff]  ;;  %v44_v4 = vld [vmem:[#allocation2 + $0x28] sm:$0xff]  ;;  %s992_s6 = sshll.u32 %s1215_s1, 4  ;;  %s993_s6 = int_to_ptr.vmem [resolvable:$true] %s992_s6 }
  0x28   :  { %v1005_v3 = vcombine.high %v39_v0, %v43_v1  ;;  %v1004_v5 = vcombine.low %v39_v0, %v43_v1  ;;  %v47_v6 = vld [vmem:[#allocation2 + $0x40] sm:$0xff]  ;;  %v1007_v8 = vcombine.high %v40_v2, %v44_v4  ;;  %v1006_v9 = vcombine.low %v40_v2, %v44_v4  ;;  %v48_v11 = vld [vmem:[#allocation2 + $0x48] sm:$0xff]  ;;  %s1183_s7 = scalar_lea.vmem %s993_s6, 1024  ;;  %p1188_p3 = scmp.lt.s32.totalorder %s993_s6, %s993_s6 }
  0x29   :  { %v51_v7 = vld [vmem:[#allocation2 + $0x60] sm:$0xff]  ;;  %v52_v12 = vld [vmem:[#allocation2 + $0x68] sm:$0xff]  ;;  %p1184_p2 = scmp.ne.s32.totalorder %s993_s6, %s1183_s7  ;;  %p1189_p4 = scmp.lt.s32.totalorder %s1183_s7, %s1183_s7 }
  0x2a   :  { %v1013_v10 = vcombine.high %v47_v6, %v51_v7  ;;  %v55_v13 = vld [vmem:[#allocation2 + $0x80] sm:$0xff]  ;;  %814 = vmatprep.subr.bf16.mxu0 %v1005_v3  ;;  %v1015_v14 = vcombine.high %v48_v11, %v52_v12  ;;  %v56_v16 = vld [vmem:[#allocation2 + $0x88] sm:$0xff]  ;;  %855 = vmatprep.subr.bf16.mxu1 %v1007_v8  ;;  %v1012_v18 = vcombine.low %v47_v6, %v51_v7 }
  0x2b   :  { %v59_v15 = vld [vmem:[#allocation2 + $0xa0] sm:$0xff]  ;;  %v60_v17 = vld [vmem:[#allocation2 + $0xa8] sm:$0xff]  ;;  %815 = vmatpush1.bf16.msra.mxu0 %v1004_v5  ;;  %856 = vmatpush1.bf16.msra.mxu1 %v1006_v9  ;;  %v1014_v19 = vcombine.low %v48_v11, %v52_v12  ;;  %p1190_p5 = por %p1189_p4, %p1188_p3 }
  0x2c   :  { %816 = vmatprep.subr.bf16.mxu0 %v1013_v10  ;;  %v1021_v20 = vcombine.high %v55_v13, %v59_v15  ;;  %857 = vmatprep.subr.bf16.mxu1 %v1015_v14  ;;  %v1023_v21 = vcombine.high %v56_v16, %v60_v17  ;;  %v63_v22 = vld [vmem:[#allocation2 + $0xc0] sm:$0xff]  ;;  %v64_v24 = vld [vmem:[#allocation2 + $0xc8] sm:$0xff]  ;;  %v1020_v26 = vcombine.low %v55_v13, %v59_v15 }
  0x2d   :  { %v67_v23 = vld [vmem:[#allocation2 + $0xe0] sm:$0xff]  ;;  %v68_v25 = vld [vmem:[#allocation2 + $0xe8] sm:$0xff]  ;;  %v1022_v27 = vcombine.low %v56_v16, %v60_v17  ;;  %p1191_p6 = pnand %p1190_p5, %p1184_p2 }
  0x2e   :  { %v1029_v28 = vcombine.high %v63_v22, %v67_v23  ;;  %v1031_v29 = vcombine.high %v64_v24, %v68_v25  ;;  %v71_v30 = vld [vmem:[#allocation2 + $0x100] sm:$0xff]  ;;  %v72_v32 = vld [vmem:[#allocation2 + $0x108] sm:$0xff]  ;;  %v1028_v34 = vcombine.low %v63_v22, %v67_v23  ;;  %v1030_v35 = vcombine.low %v64_v24, %v68_v25 }
  0x2f   :  { %817 = vmatpush1.bf16.msra.mxu0 %v1012_v18  ;;  %858 = vmatpush1.bf16.msra.mxu1 %v1014_v19  ;;  %v75_v31 = vld [vmem:[#allocation2 + $0x120] sm:$0xff]  ;;  %v76_v33 = vld [vmem:[#allocation2 + $0x128] sm:$0xff] }
  0x30   :  { %818 = vmatprep.subr.bf16.mxu0 %v1021_v20  ;;  %859 = vmatprep.subr.bf16.mxu1 %v1023_v21  ;;  %v1037_v36 = vcombine.high %v71_v30, %v75_v31  ;;  %v1039_v37 = vcombine.high %v72_v32, %v76_v33  ;;  %v79_v38 = vld [vmem:[#allocation2 + $0x140] sm:$0xff]  ;;  %v80_v40 = vld [vmem:[#allocation2 + $0x148] sm:$0xff]  ;;  %v1036_v42 = vcombine.low %v71_v30, %v75_v31 }
  0x31   :  { %v83_v39 = vld [vmem:[#allocation2 + $0x160] sm:$0xff]  ;;  %v84_v41 = vld [vmem:[#allocation2 + $0x168] sm:$0xff]  ;;  %v1038_v43 = vcombine.low %v72_v32, %v76_v33 }
  0x32   :  { %v1045_v44 = vcombine.high %v79_v38, %v83_v39  ;;  %v1047_v45 = vcombine.high %v80_v40, %v84_v41  ;;  %v87_v46 = vld [vmem:[#allocation2 + $0x180] sm:$0xff]  ;;  %v88_v48 = vld [vmem:[#allocation2 + $0x188] sm:$0xff]  ;;  %v1044_v50 = vcombine.low %v79_v38, %v83_v39  ;;  %v1046_v51 = vcombine.low %v80_v40, %v84_v41 }
  0x33   :  { %819 = vmatpush1.bf16.msra.mxu0 %v1020_v26  ;;  %860 = vmatpush1.bf16.msra.mxu1 %v1022_v27  ;;  %v91_v47 = vld [vmem:[#allocation2 + $0x1a0] sm:$0xff]  ;;  %v92_v49 = vld [vmem:[#allocation2 + $0x1a8] sm:$0xff] }
  0x34   :  { %820 = vmatprep.subr.bf16.mxu0 %v1029_v28  ;;  %861 = vmatprep.subr.bf16.mxu1 %v1031_v29  ;;  %v1053_v52 = vcombine.high %v87_v46, %v91_v47  ;;  %v1255_v53 = vld [vmem:[#allocation5] sm:$0xff]  ;;  %v1055_v54 = vcombine.high %v88_v48, %v92_v49  ;;  %v96_v58 = vld [vmem:[#allocation2 + $0x1c8] sm:$0xff]  ;;  %v1052_v60 = vcombine.low %v87_v46, %v91_v47 }
  0x35   :  { %v95_v55 = vld [vmem:[#allocation2 + $0x1c0] sm:$0xff]  ;;  %v1259_v57 = vcombine.high %v1255_v53, %v1255_v53  ;;  %v100_v59 = vld [vmem:[#allocation2 + $0x1e8] sm:$0xff]  ;;  %v1054_v61 = vcombine.low %v88_v48, %v92_v49 }
  0x36   :  { %v99_v56 = vld [vmem:[#allocation2 + $0x1e0] sm:$0xff]  ;;  %v1063_v63 = vcombine.high %v96_v58, %v100_v59  ;;  %v104_v2 = vld [vmem:[#allocation2 + $0x208] sm:$0xff]  ;;  %v1062_v5 = vcombine.low %v96_v58, %v100_v59 }
  0x37   :  { %821 = vmatpush1.bf16.msra.mxu0 %v1028_v34  ;;  %862 = vmatpush1.bf16.msra.mxu1 %v1030_v35  ;;  %v1061_v62 = vcombine.high %v95_v55, %v99_v56  ;;  %v103_v0 = vld [vmem:[#allocation2 + $0x200] sm:$0xff]  ;;  %v108_v3 = vld [vmem:[#allocation2 + $0x228] sm:$0xff]  ;;  %v1060_v4 = vcombine.low %v95_v55, %v99_v56 }
  0x38   :  { %822 = vmatprep.subr.bf16.mxu0 %v1037_v36  ;;  %863 = vmatprep.subr.bf16.mxu1 %v1039_v37  ;;  %v107_v1 = vld [vmem:[#allocation2 + $0x220] sm:$0xff]  ;;  %v1071_v7 = vcombine.high %v104_v2, %v108_v3  ;;  %v112_v10 = vld [vmem:[#allocation2 + $0x248] sm:$0xff]  ;;  %v1070_v13 = vcombine.low %v104_v2, %v108_v3  ;;  %v41_v2 = vld [vmem:[#allocation2 + $0x10] sm:$0xff] }
  0x39   :  { %846 = vmatprep.mubr.bf16.mxu0 %v1259_v57  ;;  %887 = vmatprep.mubr.bf16.mxu1 %v1259_v57  ;;  %v1069_v6 = vcombine.high %v103_v0, %v107_v1  ;;  %v111_v8 = vld [vmem:[#allocation2 + $0x240] sm:$0xff]  ;;  %v116_v11 = vld [vmem:[#allocation2 + $0x268] sm:$0xff]  ;;  %v1068_v12 = vcombine.low %v103_v0, %v107_v1  ;;  %v45_v3 = vld [vmem:[#allocation2 + $0x30] sm:$0xff] }
  0x3a   :  { %v115_v9 = vld [vmem:[#allocation2 + $0x260] sm:$0xff]  ;;  %v1079_v15 = vcombine.high %v112_v10, %v116_v11  ;;  %v120_v18 = vld [vmem:[#allocation2 + $0x288] sm:$0xff]  ;;  %v1078_v21 = vcombine.low %v112_v10, %v116_v11  ;;  %v49_v10 = vld [vmem:[#allocation2 + $0x50] sm:$0xff] }
  0x3b   :  { %823 = vmatpush1.bf16.msra.mxu0 %v1036_v42  ;;  %864 = vmatpush1.bf16.msra.mxu1 %v1038_v43  ;;  %v1077_v14 = vcombine.high %v111_v8, %v115_v9  ;;  %v119_v16 = vld [vmem:[#allocation2 + $0x280] sm:$0xff]  ;;  %v124_v19 = vld [vmem:[#allocation2 + $0x2a8] sm:$0xff]  ;;  %v1076_v20 = vcombine.low %v111_v8, %v115_v9  ;;  %v1009_v8 = vcombine.high %v41_v2, %v45_v3  ;;  %v53_v11 = vld [vmem:[#allocation2 + $0x70] sm:$0xff] }
  0x3c   :  { %824 = vmatprep.subr.bf16.mxu0 %v1045_v44  ;;  %865 = vmatprep.subr.bf16.mxu1 %v1047_v45  ;;  %v123_v17 = vld [vmem:[#allocation2 + $0x2a0] sm:$0xff]  ;;  %v1087_v23 = vcombine.high %v120_v18, %v124_v19  ;;  %v128_v26 = vld [vmem:[#allocation2 + $0x2c8] sm:$0xff]  ;;  %v1086_v29 = vcombine.low %v120_v18, %v124_v19  ;;  %v57_v19 = vld [vmem:[#allocation2 + $0x90] sm:$0xff] }
  0x3d   :  { %v1085_v22 = vcombine.high %v119_v16, %v123_v17  ;;  %v127_v24 = vld [vmem:[#allocation2 + $0x2c0] sm:$0xff]  ;;  %v132_v27 = vld [vmem:[#allocation2 + $0x2e8] sm:$0xff]  ;;  %v1084_v28 = vcombine.low %v119_v16, %v123_v17  ;;  %v1017_v17 = vcombine.high %v49_v10, %v53_v11 }
  0x3e   :  { %v131_v25 = vld [vmem:[#allocation2 + $0x2e0] sm:$0xff]  ;;  %v1095_v31 = vcombine.high %v128_v26, %v132_v27  ;;  %v136_v34 = vld [vmem:[#allocation2 + $0x308] sm:$0xff]  ;;  %v1094_v37 = vcombine.low %v128_v26, %v132_v27  ;;  %v65_v26 = vld [vmem:[#allocation2 + $0xd0] sm:$0xff] }
  0x3f   :  { %825 = vmatpush1.bf16.msra.mxu0 %v1044_v50  ;;  %866 = vmatpush1.bf16.msra.mxu1 %v1046_v51  ;;  %v1093_v30 = vcombine.high %v127_v24, %v131_v25  ;;  %v135_v32 = vld [vmem:[#allocation2 + $0x300] sm:$0xff]  ;;  %v140_v35 = vld [vmem:[#allocation2 + $0x328] sm:$0xff]  ;;  %v1092_v36 = vcombine.low %v127_v24, %v131_v25  ;;  %v69_v27 = vld [vmem:[#allocation2 + $0xf0] sm:$0xff] }
  0x40   :  { %826 = vmatprep.subr.bf16.mxu0 %v1053_v52  ;;  %867 = vmatprep.subr.bf16.mxu1 %v1055_v54  ;;  %v139_v33 = vld [vmem:[#allocation2 + $0x320] sm:$0xff]  ;;  %v1103_v39 = vcombine.high %v136_v34, %v140_v35  ;;  %v144_v42 = vld [vmem:[#allocation2 + $0x348] sm:$0xff]  ;;  %v1102_v45 = vcombine.low %v136_v34, %v140_v35  ;;  %v73_v34 = vld [vmem:[#allocation2 + $0x110] sm:$0xff] }
  0x41   :  { %v1101_v38 = vcombine.high %v135_v32, %v139_v33  ;;  %v143_v40 = vld [vmem:[#allocation2 + $0x340] sm:$0xff]  ;;  %v148_v43 = vld [vmem:[#allocation2 + $0x368] sm:$0xff]  ;;  %v1100_v44 = vcombine.low %v135_v32, %v139_v33  ;;  %v1033_v32 = vcombine.high %v65_v26, %v69_v27  ;;  %v77_v35 = vld [vmem:[#allocation2 + $0x130] sm:$0xff] }
  0x42   :  { %v147_v41 = vld [vmem:[#allocation2 + $0x360] sm:$0xff]  ;;  %v1111_v47 = vcombine.high %v144_v42, %v148_v43  ;;  %v152_v50 = vld [vmem:[#allocation2 + $0x388] sm:$0xff]  ;;  %v1110_v54 = vcombine.low %v144_v42, %v148_v43  ;;  %v85_v42 = vld [vmem:[#allocation2 + $0x170] sm:$0xff] }
  0x43   :  { %827 = vmatpush1.bf16.msra.mxu0 %v1052_v60  ;;  %868 = vmatpush1.bf16.msra.mxu1 %v1054_v61  ;;  %v1109_v46 = vcombine.high %v143_v40, %v147_v41  ;;  %v151_v48 = vld [vmem:[#allocation2 + $0x380] sm:$0xff]  ;;  %v156_v51 = vld [vmem:[#allocation2 + $0x3a8] sm:$0xff]  ;;  %v1108_v52 = vcombine.low %v143_v40, %v147_v41  ;;  %v1041_v40 = vcombine.high %v73_v34, %v77_v35  ;;  %v81_v41 = vld [vmem:[#allocation2 + $0x150] sm:$0xff] }
  0x44   :  { %828 = vmatprep.subr.bf16.mxu0 %v1061_v62  ;;  %869 = vmatprep.subr.bf16.mxu1 %v1063_v63  ;;  %v155_v49 = vld [vmem:[#allocation2 + $0x3a0] sm:$0xff]  ;;  %v1119_v56 = vcombine.high %v152_v50, %v156_v51  ;;  %v160_v60 = vld [vmem:[#allocation2 + $0x3c8] sm:$0xff]  ;;  %v1118_v63 = vcombine.low %v152_v50, %v156_v51  ;;  %v82_v43 = vld [vmem:[#allocation2 + $0x158] sm:$0xff] }
  0x45   :  { %v1117_v55 = vcombine.high %v151_v48, %v155_v49  ;;  %v159_v58 = vld [vmem:[#allocation2 + $0x3c0] sm:$0xff]  ;;  %v164_v61 = vld [vmem:[#allocation2 + $0x3e8] sm:$0xff]  ;;  %v1116_v62 = vcombine.low %v151_v48, %v155_v49  ;;  %v89_v49 = vld [vmem:[#allocation2 + $0x190] sm:$0xff] }
  0x46   :  { %v163_v59 = vld [vmem:[#allocation2 + $0x3e0] sm:$0xff]  ;;  %v1127_v1 = vcombine.high %v160_v60, %v164_v61  ;;  %v93_v50 = vld [vmem:[#allocation2 + $0x1b0] sm:$0xff]  ;;  %v90_v51 = vld [vmem:[#allocation2 + $0x198] sm:$0xff] }
  0x47   :  { %829 = vmatpush1.bf16.msra.mxu0 %v1060_v4  ;;  %870 = vmatpush1.bf16.msra.mxu1 %v1062_v5  ;;  %v1125_v0 = vcombine.high %v159_v58, %v163_v59  ;;  %v42_v4 = vld [vmem:[#allocation2 + $0x18] sm:$0xff] }
  0x48   :  { %830 = vmatprep.subr.bf16.mxu0 %v1069_v6  ;;  %871 = vmatprep.subr.bf16.mxu1 %v1071_v7  ;;  %v46_v5 = vld [vmem:[#allocation2 + $0x38] sm:$0xff]  ;;  %v1124_v6 = vcombine.low %v159_v58, %v163_v59  ;;  %v1126_v7 = vcombine.low %v160_v60, %v164_v61  ;;  %v97_v59 = vld [vmem:[#allocation2 + $0x1d0] sm:$0xff] }
  0x49   :  { %v1011_v9 = vcombine.high %v42_v4, %v46_v5  ;;  %v1010_v16 = vcombine.low %v42_v4, %v46_v5  ;;  %v101_v60 = vld [vmem:[#allocation2 + $0x1f0] sm:$0xff]  ;;  %v98_v61 = vld [vmem:[#allocation2 + $0x1d8] sm:$0xff] }
  0x4a   :  { %v109_v4 = vld [vmem:[#allocation2 + $0x230] sm:$0xff]  ;;  %v106_v5 = vld [vmem:[#allocation2 + $0x218] sm:$0xff] }
  0x4b   :  { %831 = vmatpush1.bf16.msra.mxu0 %v1068_v12  ;;  %872 = vmatpush1.bf16.msra.mxu1 %v1070_v13  ;;  %v1265_v12 = vcombine.low %v1255_v53, %v1255_v53  ;;  %v50_v13 = vld [vmem:[#allocation2 + $0x58] sm:$0xff]  ;;  %v1016_v53 = vcombine.low %v49_v10, %v53_v11  ;;  %v113_v11 = vld [vmem:[#allocation2 + $0x250] sm:$0xff] }
  0x4c   :  { %832 = vmatprep.subr.bf16.mxu0 %v1077_v14  ;;  %873 = vmatprep.subr.bf16.mxu1 %v1079_v15  ;;  %v54_v14 = vld [vmem:[#allocation2 + $0x78] sm:$0xff]  ;;  %v1008_v15 = vcombine.low %v41_v2, %v45_v3  ;;  %v105_v3 = vld [vmem:[#allocation2 + $0x210] sm:$0xff] }
  0x4d   :  { %v1019_v18 = vcombine.high %v50_v13, %v54_v14 }
  0x4f   :  { %833 = vmatpush1.bf16.msra.mxu0 %v1076_v20  ;;  %874 = vmatpush1.bf16.msra.mxu1 %v1078_v21  ;;  %v61_v20 = vld [vmem:[#allocation2 + $0xb0] sm:$0xff]  ;;  %v58_v21 = vld [vmem:[#allocation2 + $0x98] sm:$0xff] }
  0x50   :  { %834 = vmatprep.subr.bf16.mxu0 %v1085_v22  ;;  %875 = vmatprep.subr.bf16.mxu1 %v1087_v23  ;;  %v62_v22 = vld [vmem:[#allocation2 + $0xb8] sm:$0xff]  ;;  %v1018_v23 = vcombine.low %v50_v13, %v54_v14  ;;  %v1025_v24 = vcombine.high %v57_v19, %v61_v20  ;;  %v117_v13 = vld [vmem:[#allocation2 + $0x270] sm:$0xff] }
  0x51   :  { %v1027_v25 = vcombine.high %v58_v21, %v62_v22  ;;  %v114_v14 = vld [vmem:[#allocation2 + $0x258] sm:$0xff] }
  0x53   :  { %835 = vmatpush1.bf16.msra.mxu0 %v1084_v28  ;;  %876 = vmatpush1.bf16.msra.mxu1 %v1086_v29  ;;  %v66_v28 = vld [vmem:[#allocation2 + $0xd8] sm:$0xff] }
  0x54   :  { %836 = vmatprep.subr.bf16.mxu0 %v1093_v30  ;;  %877 = vmatprep.subr.bf16.mxu1 %v1095_v31  ;;  %v70_v29 = vld [vmem:[#allocation2 + $0xf8] sm:$0xff]  ;;  %v1024_v30 = vcombine.low %v57_v19, %v61_v20  ;;  %v1026_v31 = vcombine.low %v58_v21, %v62_v22  ;;  %v121_v20 = vld [vmem:[#allocation2 + $0x290] sm:$0xff] }
  0x55   :  { %v1035_v33 = vcombine.high %v66_v28, %v70_v29  ;;  %v125_v21 = vld [vmem:[#allocation2 + $0x2b0] sm:$0xff]  ;;  %v122_v22 = vld [vmem:[#allocation2 + $0x298] sm:$0xff] }
  0x57   :  { %837 = vmatpush1.bf16.msra.mxu0 %v1092_v36  ;;  %878 = vmatpush1.bf16.msra.mxu1 %v1094_v37  ;;  %v74_v36 = vld [vmem:[#allocation2 + $0x118] sm:$0xff] }
  0x58   :  { %838 = vmatprep.subr.bf16.mxu0 %v1101_v38  ;;  %879 = vmatprep.subr.bf16.mxu1 %v1103_v39  ;;  %v78_v37 = vld [vmem:[#allocation2 + $0x138] sm:$0xff]  ;;  %v1032_v38 = vcombine.low %v65_v26, %v69_v27  ;;  %v1034_v39 = vcombine.low %v66_v28, %v70_v29  ;;  %v129_v27 = vld [vmem:[#allocation2 + $0x2d0] sm:$0xff] }
  0x59   :  { %v133_v28 = vld [vmem:[#allocation2 + $0x2f0] sm:$0xff]  ;;  %v130_v29 = vld [vmem:[#allocation2 + $0x2d8] sm:$0xff] }
  0x5b   :  { %839 = vmatpush1.bf16.msra.mxu0 %v1100_v44  ;;  %880 = vmatpush1.bf16.msra.mxu1 %v1102_v45  ;;  %v86_v44 = vld [vmem:[#allocation2 + $0x178] sm:$0xff]  ;;  %v1040_v45 = vcombine.low %v73_v34, %v77_v35  ;;  %v137_v35 = vld [vmem:[#allocation2 + $0x310] sm:$0xff] }
  0x5c   :  { %840 = vmatprep.subr.bf16.mxu0 %v1109_v46  ;;  %881 = vmatprep.subr.bf16.mxu1 %v1111_v47  ;;  %v1042_v46 = vcombine.low %v74_v36, %v78_v37  ;;  %v1049_v47 = vcombine.high %v81_v41, %v85_v42  ;;  %v1051_v48 = vcombine.high %v82_v43, %v86_v44 }
  0x5f   :  { %841 = vmatpush1.bf16.msra.mxu0 %v1108_v52  ;;  %882 = vmatpush1.bf16.msra.mxu1 %v1110_v54  ;;  %v94_v52 = vld [vmem:[#allocation2 + $0x1b8] sm:$0xff]  ;;  %v1048_v54 = vcombine.low %v81_v41, %v85_v42  ;;  %v145_v42 = vld [vmem:[#allocation2 + $0x350] sm:$0xff] }
  0x60   :  { %842 = vmatprep.subr.bf16.mxu0 %v1117_v55  ;;  %883 = vmatprep.subr.bf16.mxu1 %v1119_v56  ;;  %v1050_v55 = vcombine.low %v82_v43, %v86_v44  ;;  %v1057_v56 = vcombine.high %v89_v49, %v93_v50  ;;  %v1059_v58 = vcombine.high %v90_v51, %v94_v52  ;;  %v149_v43 = vld [vmem:[#allocation2 + $0x370] sm:$0xff]  ;;  %v146_v44 = vld [vmem:[#allocation2 + $0x358] sm:$0xff] }
  0x63   :  { %843 = vmatpush1.bf16.msra.mxu0 %v1116_v62  ;;  %884 = vmatpush1.bf16.msra.mxu1 %v1118_v63  ;;  %v102_v62 = vld [vmem:[#allocation2 + $0x1f8] sm:$0xff]  ;;  %v1056_v63 = vcombine.low %v89_v49, %v93_v50  ;;  %v153_v50 = vld [vmem:[#allocation2 + $0x390] sm:$0xff] }
  0x64   :  { %844 = vmatprep.subr.bf16.mxu0 %v1125_v0  ;;  %885 = vmatprep.subr.bf16.mxu1 %v1127_v1  ;;  %v1058_v0 = vcombine.low %v90_v51, %v94_v52  ;;  %v1065_v1 = vcombine.high %v97_v59, %v101_v60  ;;  %v1067_v2 = vcombine.high %v98_v61, %v102_v62  ;;  %v157_v51 = vld [vmem:[#allocation2 + $0x3b0] sm:$0xff]  ;;  %v154_v52 = vld [vmem:[#allocation2 + $0x398] sm:$0xff] }
  0x67   :  { %845 = vmatpush1.bf16.msra.mxu0 %v1124_v6  ;;  %886 = vmatpush1.bf16.msra.mxu1 %v1126_v7  ;;  %v110_v6 = vld [vmem:[#allocation2 + $0x238] sm:$0xff]  ;;  %v1064_v7 = vcombine.low %v97_v59, %v101_v60  ;;  %v161_v60 = vld [vmem:[#allocation2 + $0x3d0] sm:$0xff] }
  0x68   :  { %896 = vmatprep.subr.bf16.mxu0 %v1009_v8  ;;  %937 = vmatprep.subr.bf16.mxu1 %v1011_v9  ;;  %v1066_v8 = vcombine.low %v98_v61, %v102_v62  ;;  %v1073_v9 = vcombine.high %v105_v3, %v109_v4  ;;  %v1075_v10 = vcombine.high %v106_v5, %v110_v6  ;;  %v165_v61 = vld [vmem:[#allocation2 + $0x3f0] sm:$0xff]  ;;  %v162_v62 = vld [vmem:[#allocation2 + $0x3d8] sm:$0xff] }
  0x6a   :  { %847 = vmatmul.mubr.bf16.vlgmr.msra.gmra.mrb[0].mxu0 %v1265_v12  ;;  %888 = vmatmul.mubr.bf16.vlgmr.msra.gmra.mrb[0].mxu1 %v1265_v12 }
  0x6b   :  { %897 = vmatpush1.bf16.msra.mxu0 %v1008_v15  ;;  %938 = vmatpush1.bf16.msra.mxu1 %v1010_v16  ;;  %v118_v15 = vld [vmem:[#allocation2 + $0x278] sm:$0xff]  ;;  %v1072_v16 = vcombine.low %v105_v3, %v109_v4  ;;  %v1128_v4 = vcombine.low %v161_v60, %v165_v61 }
  0x6c   :  { %898 = vmatprep.subr.bf16.mxu0 %v1017_v17  ;;  %939 = vmatprep.subr.bf16.mxu1 %v1019_v18  ;;  %v1074_v17 = vcombine.low %v106_v5, %v110_v6  ;;  %v1081_v18 = vcombine.high %v113_v11, %v117_v13  ;;  %v1083_v19 = vcombine.high %v114_v14, %v118_v15 }
  0x6d   :  { %928 = vmatprep.mubr.bf16.mxu0 %v1259_v57  ;;  %969 = vmatprep.mubr.bf16.mxu1 %v1259_v57  ;;  %v1043_v57 = vcombine.high %v74_v36, %v78_v37  ;;  %v141_v36 = vld [vmem:[#allocation2 + $0x330] sm:$0xff]  ;;  %v138_v37 = vld [vmem:[#allocation2 + $0x318] sm:$0xff] }
  0x6f   :  { %899 = vmatpush1.bf16.msra.mxu0 %v1016_v53  ;;  %940 = vmatpush1.bf16.msra.mxu1 %v1018_v23  ;;  %v126_v53 = vld [vmem:[#allocation2 + $0x2b8] sm:$0xff]  ;;  %v1080_v23 = vcombine.low %v113_v11, %v117_v13 }
  0x70   :  { %900 = vmatprep.subr.bf16.mxu0 %v1025_v24  ;;  %941 = vmatprep.subr.bf16.mxu1 %v1027_v25  ;;  %v1082_v24 = vcombine.low %v114_v14, %v118_v15  ;;  %v1089_v25 = vcombine.high %v121_v20, %v125_v21  ;;  %v1091_v26 = vcombine.high %v122_v22, %v126_v53 }
  0x73   :  { %901 = vmatpush1.bf16.msra.mxu0 %v1024_v30  ;;  %942 = vmatpush1.bf16.msra.mxu1 %v1026_v31  ;;  %v134_v30 = vld [vmem:[#allocation2 + $0x2f8] sm:$0xff]  ;;  %v1088_v31 = vcombine.low %v121_v20, %v125_v21 }
  0x74   :  { %902 = vmatprep.subr.bf16.mxu0 %v1033_v32  ;;  %943 = vmatprep.subr.bf16.mxu1 %v1035_v33  ;;  %v1090_v32 = vcombine.low %v122_v22, %v126_v53  ;;  %v1097_v33 = vcombine.high %v129_v27, %v133_v28  ;;  %v1099_v34 = vcombine.high %v130_v29, %v134_v30 }
  0x77   :  { %903 = vmatpush1.bf16.msra.mxu0 %v1032_v38  ;;  %944 = vmatpush1.bf16.msra.mxu1 %v1034_v39  ;;  %v142_v38 = vld [vmem:[#allocation2 + $0x338] sm:$0xff]  ;;  %v1096_v39 = vcombine.low %v129_v27, %v133_v28 }
  0x78   :  { %904 = vmatprep.subr.bf16.mxu0 %v1041_v40  ;;  %945 = vmatprep.subr.bf16.mxu1 %v1043_v57  ;;  %v1098_v40 = vcombine.low %v130_v29, %v134_v30  ;;  %v1105_v57 = vcombine.high %v137_v35, %v141_v36  ;;  %v1107_v41 = vcombine.high %v138_v37, %v142_v38 }
  0x7b   :  { %905 = vmatpush1.bf16.msra.mxu0 %v1040_v45  ;;  %946 = vmatpush1.bf16.msra.mxu1 %v1042_v46  ;;  %v150_v45 = vld [vmem:[#allocation2 + $0x378] sm:$0xff]  ;;  %v1104_v46 = vcombine.low %v137_v35, %v141_v36 }
  0x7c   :  { %906 = vmatprep.subr.bf16.mxu0 %v1049_v47  ;;  %947 = vmatprep.subr.bf16.mxu1 %v1051_v48  ;;  %v1106_v47 = vcombine.low %v138_v37, %v142_v38  ;;  %v1113_v48 = vcombine.high %v145_v42, %v149_v43  ;;  %v1115_v49 = vcombine.high %v146_v44, %v150_v45 }
  0x7f   :  { %907 = vmatpush1.bf16.msra.mxu0 %v1048_v54  ;;  %948 = vmatpush1.bf16.msra.mxu1 %v1050_v55  ;;  %v158_v54 = vld [vmem:[#allocation2 + $0x3b8] sm:$0xff]  ;;  %v1112_v55 = vcombine.low %v145_v42, %v149_v43 }
  0x80   :  { %908 = vmatprep.subr.bf16.mxu0 %v1057_v56  ;;  %949 = vmatprep.subr.bf16.mxu1 %v1059_v58  ;;  %v1114_v56 = vcombine.low %v146_v44, %v150_v45  ;;  %v1121_v58 = vcombine.high %v153_v50, %v157_v51  ;;  %v1123_v59 = vcombine.high %v154_v52, %v158_v54 }
  0x83   :  { %909 = vmatpush1.bf16.msra.mxu0 %v1056_v63  ;;  %950 = vmatpush1.bf16.msra.mxu1 %v1058_v0  ;;  %v166_v63 = vld [vmem:[#allocation2 + $0x3f8] sm:$0xff]  ;;  %v1120_v0 = vcombine.low %v153_v50, %v157_v51 }
  0x84   :  { %910 = vmatprep.subr.bf16.mxu0 %v1065_v1  ;;  %951 = vmatprep.subr.bf16.mxu1 %v1067_v2  ;;  %v1122_v1 = vcombine.low %v154_v52, %v158_v54  ;;  %v1129_v2 = vcombine.high %v161_v60, %v165_v61  ;;  %v1131_v3 = vcombine.high %v162_v62, %v166_v63 }
  0x85   :  { %v1130_v5 = vcombine.low %v162_v62, %v166_v63 }
  0x87   :  { %911 = vmatpush1.bf16.msra.mxu0 %v1064_v7  ;;  %952 = vmatpush1.bf16.msra.mxu1 %v1066_v8 }
  0x88   :  { %912 = vmatprep.subr.bf16.mxu0 %v1073_v9  ;;  %953 = vmatprep.subr.bf16.mxu1 %v1075_v10 }
  0x8b   :  { %913 = vmatpush1.bf16.msra.mxu0 %v1072_v16  ;;  %954 = vmatpush1.bf16.msra.mxu1 %v1074_v17 }
  0x8c   :  { %914 = vmatprep.subr.bf16.mxu0 %v1081_v18  ;;  %955 = vmatprep.subr.bf16.mxu1 %v1083_v19 }
  0x8f   :  { %915 = vmatpush1.bf16.msra.mxu0 %v1080_v23  ;;  %956 = vmatpush1.bf16.msra.mxu1 %v1082_v24 }
  0x90   :  { %916 = vmatprep.subr.bf16.mxu0 %v1089_v25  ;;  %957 = vmatprep.subr.bf16.mxu1 %v1091_v26 }
  0x93   :  { %917 = vmatpush1.bf16.msra.mxu0 %v1088_v31  ;;  %958 = vmatpush1.bf16.msra.mxu1 %v1090_v32 }
  0x94   :  { %918 = vmatprep.subr.bf16.mxu0 %v1097_v33  ;;  %959 = vmatprep.subr.bf16.mxu1 %v1099_v34 }
  0x97   :  { %919 = vmatpush1.bf16.msra.mxu0 %v1096_v39  ;;  %960 = vmatpush1.bf16.msra.mxu1 %v1098_v40 }
  0x98   :  { %920 = vmatprep.subr.bf16.mxu0 %v1105_v57  ;;  %961 = vmatprep.subr.bf16.mxu1 %v1107_v41 }
  0x9b   :  { %921 = vmatpush1.bf16.msra.mxu0 %v1104_v46  ;;  %962 = vmatpush1.bf16.msra.mxu1 %v1106_v47 }
  0x9c   :  { %922 = vmatprep.subr.bf16.mxu0 %v1113_v48  ;;  %963 = vmatprep.subr.bf16.mxu1 %v1115_v49 }
  0x9f   :  { %923 = vmatpush1.bf16.msra.mxu0 %v1112_v55  ;;  %964 = vmatpush1.bf16.msra.mxu1 %v1114_v56 }
  0xa0   :  { %924 = vmatprep.subr.bf16.mxu0 %v1121_v58  ;;  %965 = vmatprep.subr.bf16.mxu1 %v1123_v59 }
  0xa3   :  { %925 = vmatpush1.bf16.msra.mxu0 %v1120_v0  ;;  %966 = vmatpush1.bf16.msra.mxu1 %v1122_v1 }
  0xa4   :  { %926 = vmatprep.subr.bf16.mxu0 %v1129_v2  ;;  %967 = vmatprep.subr.bf16.mxu1 %v1131_v3 }
  0xa7   :  { %927 = vmatpush1.bf16.msra.mxu0 %v1128_v4  ;;  %968 = vmatpush1.bf16.msra.mxu1 %v1130_v5 }
  0xaa   :  { %929 = vmatmul.mubr.bf16.vlgmr.msra.gmra.mrb[4].mxu0 %v1265_v12  ;;  %970 = vmatmul.mubr.bf16.vlgmr.msra.gmra.mrb[4].mxu1 %v1265_v12 }
 0x13d   :  { %v848_v6 = vpop.f32.mrb[0].mxu0  ;;  %v889_v7 = vpop.f32.mrb[0].mxu1 }
 0x13e   :  { %978 = vst [vmem:[#allocation7] sm:$0xff] %v848_v6  ;;  %v850_v8 = vpop.f32.mrb[1].mxu0  ;;  %980 = vst [vmem:[#allocation7 + $0x10] sm:$0xff] %v889_v7  ;;  %v891_v9 = vpop.f32.mrb[1].mxu1 }
 0x13f   :  { %979 = vst [vmem:[#allocation7 + $0x8] sm:$0xff] %v850_v8  ;;  %v852_v10 = vpop.f32.mrb[2].mxu0  ;;  %981 = vst [vmem:[#allocation7 + $0x18] sm:$0xff] %v891_v9  ;;  %v893_v11 = vpop.f32.mrb[2].mxu1 }
 0x140   :  { %v853_v13 = vpop.f32.mrb[3].mxu0  ;;  %v894_v14 = vpop.f32.mrb[3].mxu1 }
 0x17d   :  { %v930_v15 = vpop.f32.mrb[4].mxu0  ;;  %v971_v16 = vpop.f32.mrb[4].mxu1 }
 0x17e   :  { %982 = vst [vmem:[#allocation7 + $0x20] sm:$0xff] %v930_v15  ;;  %v932_v17 = vpop.f32.mrb[5].mxu0  ;;  %984 = vst [vmem:[#allocation7 + $0x30] sm:$0xff] %v971_v16  ;;  %v973_v12 = vpop.f32.mrb[5].mxu1 }
 0x17f   :  { %983 = vst [vmem:[#allocation7 + $0x28] sm:$0xff] %v932_v17  ;;  %v934_v18 = vpop.f32.mrb[6].mxu0  ;;  %985 = vst [vmem:[#allocation7 + $0x38] sm:$0xff] %v973_v12  ;;  %v975_v19 = vpop.f32.mrb[6].mxu1 }
 0x180   :  { %v935_v20 = vpop.f32.mrb[7].mxu0  ;;  %v976_v21 = vpop.f32.mrb[7].mxu1 }
 0x181   :  { %1194 = shalt.err (!%p1191_p6)
}
 0x182   :  { %s1195_s10 = scalar_lea.hbm %s1287_s2, 1024 }
 0x183   :  { %p1196_p7 = scmp.ne.s32.totalorder %s1287_s2, %s1195_s10  ;;  %p1199_p8 = scmp.lt.u32.totalorder %s1195_s10, %s1287_s2 }
 0x185   :  { %p1201_p9 = pnand %p1199_p8, %p1196_p7 }
 0x187   :  { %1204 = shalt.err (!%p1201_p9)
}
 0x188   :  { %995 = dma.vmem_to_hbm [thread:$0]  %s993_s6, 1024, %s1287_s2, [#allocation4]  }
 0x189   :  { %1209 = dma.done.wait [#allocation4], 1024  }
 0x18a   :  { %1210 = vsyncadd [#allocation4], 4294966272 }
 0x18b   :  { %999 = vsyncpa [#allocation3], 1 }
 0x18c   :  { %1000 = vsyncpa [#allocation6], 1 }
 0x18d   :  { %1001 = vsyncpa [#allocation4], 1 }

</bundles_post_ra>
